<compile_context>
chip_gen: v7x
topology: tpu7x:2x2x1
jax: 0.10.0
libtpu: 0.0.40
codegen_flags: <defaults>
</compile_context>

<pallas_src>
import jax
import jax.numpy as jnp
from jax.experimental import pallas as pl
from jax.experimental.pallas import tpu as pltpu


# --------------------------------------------------------------------------
# Forward pass of M: pure metadata reshape (zero-cost, exact .view semantics).
# --------------------------------------------------------------------------
def add_view(x395, x393):
    """M.forward: x396 = x395 + (256,); return x393.view(x396)."""
    x396 = tuple(x395) + (256,)
    b, s, h, d = x393.shape
    assert x396 == (b, s, h * d), f"view target {x396} incompatible with {x393.shape}"
    # Row-major flatten of contiguous trailing dims == torch .view; XLA treats
    # this as a bitcast (0 bytes moved, 0 cycles). Returned directly.
    return jnp.reshape(x393, x396)


# --------------------------------------------------------------------------
# Demonstration consumer kernel: reads x393 through the flattened layout via
# its BlockSpec ("fold the view into the consumer"). Costs one HBM round trip
# (acknowledged — aliasing would not make it free), so it is kept OFF the
# add_view path and used here only to validate the layout / exercise Pallas.
# --------------------------------------------------------------------------
def _flat_view_consumer_kernel(x_ref, o_ref):
    # x_ref is a (1, TILE_S, 256) lane-dense tile of the flattened view.
    # A real downstream kernel would do its compute here (e.g. matmul over
    # the 256-dim); this demo just materializes the tile it consumed.
    o_ref[...] = x_ref[...]


def consume_view_with_pallas(x393, x395, *, tile_s=128):
    """Shows a consumer reading x393 via a flattened-layout BlockSpec."""
    x_flat = add_view(x395, x393)                     # metadata-only bitcast
    b, s, hd = x_flat.shape
    assert s % tile_s == 0, (s, tile_s)
    return pl.pallas_call(
        _flat_view_consumer_kernel,
        out_shape=jax.ShapeDtypeStruct((b, s, hd), x_flat.dtype),
        grid=(s // tile_s,),
        in_specs=[pl.BlockSpec((b, tile_s, hd), lambda i: (0, i, 0))],
        out_specs=pl.BlockSpec((b, tile_s, hd), lambda i: (0, i, 0)),
    )(x_flat)


if __name__ == "__main__":
    key = jax.random.PRNGKey(0)
    # Shapes exactly as implied by the module (already small: 384 KiB f32).
    x393 = jax.random.normal(key, (1, 384, 4, 64), dtype=jnp.float32)
    x395 = (1, 384)

    # Forward pass of M (pure reshape path — the optimized implementation).
    y = add_view(x395, x393)
    y = jax.block_until_ready(y)
    ref = x393.reshape((1, 384, 256))
    assert y.shape == (1, 384, 256), y.shape
    assert y.dtype == x393.dtype
    assert bool(jnp.all(y == ref)), "add_view mismatch vs reference reshape"

    # Run the Pallas consumer-pattern kernel once to validate the flattened
    # BlockSpec layout on-device.
    z = consume_view_with_pallas(x393, x395)
    z = jax.block_until_ready(z)
    assert z.shape == (1, 384, 256), z.shape
    assert bool(jnp.all(z == ref)), "pallas consumer mismatch vs reference"

    print("KERNEL_OK")
</pallas_src>

<mosaic_0001>
module attributes {stable_mosaic.version = 11 : i64} {
  func.func @_flat_view_consumer_kernel(%arg0: i32, %arg1: memref<1x128x256xf32, #tpu.memory_space<vmem>>, %arg2: memref<1x128x256xf32, #tpu.memory_space<vmem>>) attributes {dimension_semantics = [#tpu.dimension_semantics<arbitrary>], iteration_bounds = array<i64: 3>, scalar_prefetch = 0 : i64, scratch_operands = 0 : i64, tpu.core_type = #tpu.core_type<tc>, window_params = [{transform_indices = @transform_0, window_bounds = array<i64: 1, 128, 256>}, {transform_indices = @transform_1, window_bounds = array<i64: 1, 128, 256>}]} {
    %c0 = arith.constant 0 : index
    %c0_0 = arith.constant 0 : index
    %c0_1 = arith.constant 0 : index
    %0 = vector.load %arg1[%c0, %c0_0, %c0_1] : memref<1x128x256xf32, #tpu.memory_space<vmem>>, vector<1x128x256xf32>
    %c0_2 = arith.constant 0 : index
    %c0_3 = arith.constant 0 : index
    %c0_4 = arith.constant 0 : index
    %1 = vector.load %arg2[%c0_2, %c0_3, %c0_4] : memref<1x128x256xf32, #tpu.memory_space<vmem>>, vector<1x128x256xf32>
    tpu.vector_store %arg2[%c0_2, %c0_3, %c0_4], %0 {strides = array<i32>} : memref<1x128x256xf32, #tpu.memory_space<vmem>>, vector<1x128x256xf32>,
    return
  }
  func.func @transform_0(%arg0: i32) -> (i32, i32, i32) {
    %c0_i32 = arith.constant 0 : i32
    %c0_i32_0 = arith.constant 0 : i32
    %c0_i32_1 = arith.constant 0 : i32
    return %c0_i32, %arg0, %c0_i32_0 : i32, i32, i32
  }
  func.func @transform_1(%arg0: i32) -> (i32, i32, i32) {
    %c0_i32 = arith.constant 0 : i32
    %c0_i32_0 = arith.constant 0 : i32
    %c0_i32_1 = arith.constant 0 : i32
    return %c0_i32, %arg0, %c0_i32_0 : i32, i32, i32
  }
}

</mosaic_0001>

<bundles_post_ra>
// kernel: tpu_custom_call.1
= control target key start
LH: loop header
LB: loop body
LE: loop exit
PB: predicated region body
PF: predicated region fallthrough
CT: control target
= control target key end

     0   :  { %6 = vsyncpa [#allocation3], 0  ;;  %s703_s0 = inlined_call_operand.hbm [shape: f32[1,384,256], index: 0, kind: input, shape index: {}]   ;;  %s704_s1 = inlined_call_operand.hbm [shape: f32[1,384,256], index: 1, kind: output, shape index: {}]  }
   0x1   :  { %8 = vsyncpa [#allocation3 + $0x1], 0 }
   0x2   :  { %9 = vsyncpa [#allocation4], 0 }
   0x3   :  { %11 = vsyncpa [#allocation4 + $0x1], 0  ;;  %s474_s6 = smov 0   ;;  %s476_s7 = smov 0  }
   0x4   :  { %s478_s8 = smov 0   ;;  %s480_s9 = smov 0  }
   0x5 LB: > { %s495_s10 = sadd.s32 4294967295, %s456_s9   ;;  %s290_s11 = sadd.s32 4294967294, %s456_s9   ;;  %s456_s9 = sphi %s480_s9, %s716_s9   ;;  %s452_s8 = sphi %s478_s8, %s715_s8   ;;  %s448_s7 = sphi %s476_s7, %s714_s7   ;;  %s444_s6 = sphi %s474_s6, %s713_s6  }
   0x6   : > { %s499_s12 = sadd.s32 1, %s456_s9   ;;  %s24_s13 = sadd.s32 1, %s452_s8 }
   0x7   : > { %s21_s14 = ssub.s32 %s456_s9, %s499_s12  ;;  %p31_p0 = scmp.ne.s32.totalorder %s452_s8, %s448_s7 }
   0x8   : > { %p22_p1 = scmp.eq.s32.totalorder %s21_s14, 0  ;;  %p32_p2 = scmp.eq.s32.totalorder %s456_s9, 0 }
   0x9   : > { %p37_p3 = scmp.ne.s32.totalorder %s448_s7, %s444_s6  ;;  %p38_p4 = scmp.eq.s32.totalorder %s495_s10, 0 }
   0xa   : > { %s511_s15 = scalar_select %p22_p1, %s452_s8, %s24_s13  }
   0xb   : > { %p513_p5 = por %p32_p2, %p31_p0  ;;  %p517_p6 = por %p38_p4, %p37_p3 }
   0xc   : > { %p61_p7 = scmp.eq.s32.totalorder %s495_s10, 2  ;;  %p67_p8 = scmp.eq.s32.totalorder %s290_s11, 2 }
   0xd   : > { %p322_p9 = scmp.lt.s32.totalorder %s456_s9, 3  ;;  %s87_s20 = sand.u32 1, %s452_s8  }
   0xe   : > { %p523_p10 = por %p61_p7, %p31_p0  ;;  %p527_p11 = por %p67_p8, %p37_p3 }
   0xf   : > { %s307_s21 = sshll.u32 %s456_s9, 12  ;;  %s293_s22 = sshll.u32 %s87_s20, 8 }
  0x10   : > { %s708_s18 = scalar_select %p523_p10, 1, 0 }
  0x11   : > { %s709_s19 = scalar_select %p527_p11, 1, 0 }
  0x12   : > { %s536_s25 = scalar_lea.hbm %s703_s0, %s307_s21  ;;  %s91_s26 = scalar_lea.vmem [#allocation2], %s293_s22 }
  0x13   : > { %s99_s27 = sshll.u32 %s91_s26, 4  ;;  %p540_p12 = pnand %p322_p9, %p513_p5  ;;  %s544_s27 = int_to_ptr.vmem [resolvable:$true] %s99_s27 }
  0x14   : > { %s546_s29 = scalar_lea.sflag [#allocation3], %s87_s20  ;;  %s360_s30 = scalar_lea.hbm %s536_s25, 4096 }
  0x15   : > { %p361_p13 = scmp.ne.s32.totalorder %s536_s25, %s360_s30  ;;  %p362_p0 = pneg %p540_p12 }
  0x16   : > { %s365_s4 = scalar_lea.hbm %s703_s0, 12288  ;;  %p366_p3 = scmp.lt.u32.totalorder %s536_s25, %s703_s0 }
  0x17   : > { %p363_p1 = pnand %p362_p0, %p361_p13  ;;  %p367_p4 = scmp.lt.u32.totalorder %s365_s4, %s360_s30 }
  0x18   : > { %p369_p7 = scmp.lt.u32.totalorder %s360_s30, %s536_s25 }
  0x19   : > { %p364_p2 = pneg %p363_p1  ;;  %p368_p5 = por %p367_p4, %p366_p3 }
  0x1b   : > { %p370_p8 = por %p369_p7, %p368_p5 }
  0x1d   : > { %p371_p9 = pnand %p370_p8, %p364_p2 }
  0x1f   : > { %374 = shalt.err (!%p371_p9)
}
  0x20   : > { %s375_s13 = scalar_lea.vmem %s544_s27, 4096  ;;  %s458_s14 = smov [#allocation2]  }
  0x21   : > { %p376_p13 = scmp.ne.s32.totalorder %s544_s27, %s375_s13  ;;  %s380_s16 = sshll.u32 %s458_s14, 4  ;;  %s381_s16 = int_to_ptr.vmem [resolvable:$false] %s380_s16 }
  0x22   : > { %s382_s20 = scalar_lea.vmem %s381_s16, 8192  ;;  %p383_p10 = scmp.lt.s32.totalorder %s544_s27, %s381_s16 }
  0x23   : > { %p378_p1 = pnand %p376_p13, %p362_p0  ;;  %p384_p3 = scmp.lt.s32.totalorder %s382_s20, %s375_s13 }
  0x25   : > { %p379_p11 = pneg %p378_p1  ;;  %p385_p4 = por %p384_p3, %p383_p10 }
  0x27   : > { %p386_p5 = pnand %p385_p4, %p379_p11 }
  0x29   : > { %389 = shalt.err (!%p386_p5)
}
  0x2a   : > { %s459_s21 = smov 256   ;;  %s460_s22 = smov 16  }
  0x2b   : > { %317 = dma.hbm_to_vmem [thread:$0]  (!%p540_p12), %s536_s25, 4096, %s544_s27, %s546_s29, %s459_s21, %s459_s21, %s460_s22  }
  0x2c   : > { %p297_p0 = scmp.ge.s32.totalorder %s456_s9, 1  ;;  %p107_p2 = scmp.lt.s32.totalorder %s456_s9, 4 }
  0x2e   : > { %p108_p7 = pnand %p297_p0, %p107_p2 }
  0x2f   : > { %s577_s23 = sand.u32 (!%p108_p7), 1, %s448_s7  }
  0x30   : > { %111 = sbr.rel (%p108_p7) target bundleno = 87 (0x57), region = 24  ;;  %s298_s24 = sshll.u32 (!%p108_p7), %s577_s23, 8 }
  0x31   : > { %s114_s26 = scalar_lea.sflag (!%p108_p7), [#allocation3], %s577_s23  ;;  %s581_s30 = scalar_lea.vmem (!%p108_p7), [#allocation2], %s298_s24 }
  0x37   : > { %435 = dma.done.wait (%p517_p6), %s114_s26, 4096  }
  0x38   : > { %437 = vsyncadd (%p517_p6), %s114_s26, 4294963200  ;;  %v138_v0 = vld [vmem:[%s581_s30] sm:$0xff]  ;;  %v139_v1 = vld [vmem:[%s581_s30 + $0x8] sm:$0xff]  ;;  %s590_s25 = scalar_lea.vmem [#allocation5], %s298_s24  ;;  %s309_s17 = sshll.u32 %s495_s10, 12 }
  0x39   : > { %v140_v2 = vld [vmem:[%s581_s30 + $0x10] sm:$0xff]  ;;  %170 = vst [vmem:[%s590_s25] sm:$0xff] %v138_v0  ;;  %171 = vst [vmem:[%s590_s25 + $0x8] sm:$0xff] %v139_v1  ;;  %v141_v3 = vld [vmem:[%s581_s30 + $0x18] sm:$0xff]  ;;  %s217_s27 = sshll.u32 %s590_s25, 4  ;;  %s645_s29 = scalar_lea.hbm %s704_s1, %s309_s17  ;;  %s647_s27 = int_to_ptr.vmem [resolvable:$true] %s217_s27 }
  0x3a   : > { %172 = vst [vmem:[%s590_s25 + $0x10] sm:$0xff] %v140_v2  ;;  %v142_v4 = vld [vmem:[%s581_s30 + $0x20] sm:$0xff]  ;;  %v143_v5 = vld [vmem:[%s581_s30 + $0x28] sm:$0xff]  ;;  %173 = vst [vmem:[%s590_s25 + $0x18] sm:$0xff] %v141_v3  ;;  %s203_s2 = scalar_lea.sflag [#allocation4], %s577_s23  ;;  %s390_s3 = scalar_lea.vmem %s647_s27, 4096 }
  0x3b   : > { %174 = vst [vmem:[%s590_s25 + $0x20] sm:$0xff] %v142_v4  ;;  %175 = vst [vmem:[%s590_s25 + $0x28] sm:$0xff] %v143_v5  ;;  %v144_v6 = vld [vmem:[%s581_s30 + $0x30] sm:$0xff]  ;;  %v145_v7 = vld [vmem:[%s581_s30 + $0x38] sm:$0xff]  ;;  %p391_p6 = scmp.ne.s32.totalorder %s647_s27, %s390_s3  ;;  %p711_p10 = scmp.ne.s32.totalorder %s708_s18, 0 }
  0x3c   : > { %v146_v8 = vld [vmem:[%s581_s30 + $0x40] sm:$0xff]  ;;  %176 = vst [vmem:[%s590_s25 + $0x30] sm:$0xff] %v144_v6  ;;  %177 = vst [vmem:[%s590_s25 + $0x38] sm:$0xff] %v145_v7  ;;  %v147_v9 = vld [vmem:[%s581_s30 + $0x48] sm:$0xff]  ;;  %s461_s4 = smov [#allocation5]  }
  0x3d   : > { %178 = vst [vmem:[%s590_s25 + $0x40] sm:$0xff] %v146_v8  ;;  %v148_v10 = vld [vmem:[%s581_s30 + $0x50] sm:$0xff]  ;;  %v149_v11 = vld [vmem:[%s581_s30 + $0x58] sm:$0xff]  ;;  %179 = vst [vmem:[%s590_s25 + $0x48] sm:$0xff] %v147_v9  ;;  %p392_p11 = pnand %p391_p6, %p711_p10  ;;  %s394_s5 = sshll.u32 %s461_s4, 4  ;;  %s395_s5 = int_to_ptr.vmem [resolvable:$false] %s394_s5 }
  0x3e   : > { %180 = vst [vmem:[%s590_s25 + $0x50] sm:$0xff] %v148_v10  ;;  %181 = vst [vmem:[%s590_s25 + $0x58] sm:$0xff] %v149_v11  ;;  %v150_v12 = vld [vmem:[%s581_s30 + $0x60] sm:$0xff]  ;;  %v151_v13 = vld [vmem:[%s581_s30 + $0x68] sm:$0xff]  ;;  %s396_s11 = scalar_lea.vmem %s395_s5, 8192  ;;  %p397_p8 = scmp.lt.s32.totalorder %s647_s27, %s395_s5 }
  0x3f   : > { %v152_v14 = vld [vmem:[%s581_s30 + $0x70] sm:$0xff]  ;;  %182 = vst [vmem:[%s590_s25 + $0x60] sm:$0xff] %v150_v12  ;;  %183 = vst [vmem:[%s590_s25 + $0x68] sm:$0xff] %v151_v13  ;;  %v153_v15 = vld [vmem:[%s581_s30 + $0x78] sm:$0xff]  ;;  %p393_p12 = pneg %p392_p11  ;;  %p398_p9 = scmp.lt.s32.totalorder %s396_s11, %s390_s3 }
  0x40   : > { %184 = vst [vmem:[%s590_s25 + $0x70] sm:$0xff] %v152_v14  ;;  %v154_v16 = vld [vmem:[%s581_s30 + $0x80] sm:$0xff]  ;;  %v155_v17 = vld [vmem:[%s581_s30 + $0x88] sm:$0xff]  ;;  %185 = vst [vmem:[%s590_s25 + $0x78] sm:$0xff] %v153_v15 }
  0x41   : > { %186 = vst [vmem:[%s590_s25 + $0x80] sm:$0xff] %v154_v16  ;;  %187 = vst [vmem:[%s590_s25 + $0x88] sm:$0xff] %v155_v17  ;;  %v156_v18 = vld [vmem:[%s581_s30 + $0x90] sm:$0xff]  ;;  %v157_v19 = vld [vmem:[%s581_s30 + $0x98] sm:$0xff]  ;;  %p399_p13 = por %p398_p9, %p397_p8 }
  0x42   : > { %v158_v20 = vld [vmem:[%s581_s30 + $0xa0] sm:$0xff]  ;;  %188 = vst [vmem:[%s590_s25 + $0x90] sm:$0xff] %v156_v18  ;;  %189 = vst [vmem:[%s590_s25 + $0x98] sm:$0xff] %v157_v19  ;;  %v159_v21 = vld [vmem:[%s581_s30 + $0xa8] sm:$0xff] }
  0x43   : > { %190 = vst [vmem:[%s590_s25 + $0xa0] sm:$0xff] %v158_v20  ;;  %v160_v22 = vld [vmem:[%s581_s30 + $0xb0] sm:$0xff]  ;;  %v161_v23 = vld [vmem:[%s581_s30 + $0xb8] sm:$0xff]  ;;  %191 = vst [vmem:[%s590_s25 + $0xa8] sm:$0xff] %v159_v21  ;;  %p400_p1 = pnand %p399_p13, %p393_p12 }
  0x44   : > { %192 = vst [vmem:[%s590_s25 + $0xb0] sm:$0xff] %v160_v22  ;;  %193 = vst [vmem:[%s590_s25 + $0xb8] sm:$0xff] %v161_v23  ;;  %v162_v24 = vld [vmem:[%s581_s30 + $0xc0] sm:$0xff]  ;;  %v163_v25 = vld [vmem:[%s581_s30 + $0xc8] sm:$0xff] }
  0x45   : > { %v164_v26 = vld [vmem:[%s581_s30 + $0xd0] sm:$0xff]  ;;  %194 = vst [vmem:[%s590_s25 + $0xc0] sm:$0xff] %v162_v24  ;;  %195 = vst [vmem:[%s590_s25 + $0xc8] sm:$0xff] %v163_v25  ;;  %v165_v27 = vld [vmem:[%s581_s30 + $0xd8] sm:$0xff] }
  0x46   : > { %196 = vst [vmem:[%s590_s25 + $0xd0] sm:$0xff] %v164_v26  ;;  %v166_v28 = vld [vmem:[%s581_s30 + $0xe0] sm:$0xff]  ;;  %v167_v29 = vld [vmem:[%s581_s30 + $0xe8] sm:$0xff]  ;;  %197 = vst [vmem:[%s590_s25 + $0xd8] sm:$0xff] %v165_v27 }
  0x47   : > { %198 = vst [vmem:[%s590_s25 + $0xe0] sm:$0xff] %v166_v28  ;;  %199 = vst [vmem:[%s590_s25 + $0xe8] sm:$0xff] %v167_v29  ;;  %v168_v30 = vld [vmem:[%s581_s30 + $0xf0] sm:$0xff]  ;;  %v169_v31 = vld [vmem:[%s581_s30 + $0xf8] sm:$0xff] }
  0x48   : > { %200 = vst [vmem:[%s590_s25 + $0xf0] sm:$0xff] %v168_v30  ;;  %201 = vst [vmem:[%s590_s25 + $0xf8] sm:$0xff] %v169_v31 }
  0x49   : > { %403 = shalt.err (!%p400_p1)
}
  0x4a   : > { %s404_s13 = scalar_lea.hbm %s645_s29, 4096  ;;  %s408_s20 = scalar_lea.hbm %s704_s1, 12288 }
  0x4b   : > { %p405_p3 = scmp.ne.s32.totalorder %s645_s29, %s404_s13  ;;  %p409_p0 = scmp.lt.u32.totalorder %s645_s29, %s704_s1 }
  0x4c   : > { %p410_p2 = scmp.lt.u32.totalorder %s408_s20, %s404_s13  ;;  %p412_p6 = scmp.lt.u32.totalorder %s404_s13, %s645_s29 }
  0x4d   : > { %p406_p4 = pnand %p405_p3, %p711_p10 }
  0x4e   : > { %p411_p7 = por %p410_p2, %p409_p0 }
  0x4f   : > { %p407_p5 = pneg %p406_p4 }
  0x50   : > { %p413_p11 = por %p412_p6, %p411_p7 }
  0x52   : > { %p414_p12 = pnand %p413_p11, %p407_p5 }
  0x54   : > { %417 = shalt.err (!%p414_p12)
}
  0x55   : > { %s462_s24 = smov 256   ;;  %s463_s26 = smov 16  }
  0x56   : > { %312 = dma.vmem_to_hbm [thread:$0]  (%p711_p10), %s647_s27, 4096, %s645_s29, %s203_s2, %s462_s24, %s462_s24, %s463_s26  }
  0x57 PF: > { %p323_p8 = scmp.ge.s32.totalorder %s456_s9, 2  ;;  %s232_s30 = sand.u32 1, %s444_s6  }
  0x58   : > { %p712_p9 = scmp.ne.s32.totalorder %s709_s19, 0  ;;  %s233_s25 = scalar_lea.sflag [#allocation4], %s232_s30 }
  0x5a   : > { %p319_p13 = pnand %p323_p8, %p712_p9 }
  0x5c   : > { %439 = dma.done.wait (!%p319_p13), %s233_s25, 4096  }
  0x5d   : > { %441 = vsyncadd (!%p319_p13), %s233_s25, 4294963200  ;;  %p14_p1 = scmp.ge.s32.totalorder %s499_s12, 5   ;;  %s713_s6 = smov %s448_s7 }
  0x5e   : > { %s714_s7 = smov %s452_s8  ;;  %s715_s8 = smov %s511_s15 }
  0x5f   : > { %s716_s9 = smov %s499_s12  ;;  %16 = sbr.rel (!%p14_p1) target bundleno = 5 (0x5), region = 69 }
  0x66   :  { %238 = vsyncpa [#allocation3], 1 }
  0x67   :  { %240 = vsyncpa [#allocation3 + $0x1], 1 }
  0x68   :  { %241 = vsyncpa [#allocation4], 1 }
  0x69   :  { %243 = vsyncpa [#allocation4 + $0x1], 1 }

</bundles_post_ra>
